<compile_context>
chip_gen: v7x
topology: tpu7x:2x2x1
jax: 0.10.0
libtpu: 0.0.40
codegen_flags: <defaults>
</compile_context>

<pallas_src>
import jax
import jax.numpy as jnp
from jax.experimental import pallas as pl
from jax.experimental.pallas import tpu as pltpu


def _scse_spatial_kernel(x_ref, ws_ref, bs_ref, cg_ref, o_ref):
    # x_ref : (1, C, THW)  io-dtype   spatial tile of one batch element (HW on lanes)
    # ws_ref: (C, C)       bf16       sSE 1x1-conv weight, native (out, in) layout
    # bs_ref: (C, 1)       f32        sSE bias
    # cg_ref: (1, C, 1)    f32        precomputed channel gate sigmoid(cSE(x)) for this batch
    # o_ref : (1, C, THW)  io-dtype
    x = x_ref[0]                                                    # (C, THW)

    # sSE per-pixel 1x1 conv: (Cout,Cin) @ (Cin,THW) -> (Cout,THW). MXU bf16, f32 acc.
    sg = jnp.dot(ws_ref[...], x.astype(jnp.bfloat16),
                 preferred_element_type=jnp.float32)                # (C, THW) f32
    z = sg + bs_ref[...]                                            # bias broadcast over lanes
    # sigmoid(z) = 0.5*(1 + tanh(z/2)): one EUP transcendental per element (vs exp+recip).
    sgate = 0.5 * (1.0 + jnp.tanh(0.5 * z))

    # x*cSE + x*sSE == x * (cSE + sSE): saves one full-tile multiply.
    o_ref[0] = (x.astype(jnp.float32) * (cg_ref[0] + sgate)).astype(o_ref.dtype)


def _pick_spatial_tile(HW, C, itemsize, n_batch, tile_budget_bytes=4 << 20):
    """Spatial tile length THW: a multiple of 128, as large as the ~4 MiB budget allows.

    ~4 MiB per x tile keeps double-buffered in+out (~4x tile) plus the resident
    weight/bias/gate comfortably inside v7x's 64 MiB physical VMEM while being large
    enough to amortize the ~0.35 us per-grid-step pipeline overhead.
    """
    hw_pad128 = pl.cdiv(HW, 128) * 128
    max_thw = max(128, (tile_budget_bytes // (C * itemsize)) // 128 * 128)
    thw = min(hw_pad128, max_thw)
    # v7x has 2 TensorCores: make sure the parallel grid has >= 2 total steps.
    if n_batch == 1 and thw >= hw_pad128 and thw >= 256:
        thw = max(128, (thw // 2) // 128 * 128)
    return thw


def scse_pallas(x_nchw, w1, b1, w2, b2, ws, bs):
    """SCSE forward. x_nchw: (N, C, H, W). Conv weights in PyTorch (out, in) 1x1 layout."""
    N, C, H, W = x_nchw.shape
    HW = H * W
    io_dtype = x_nchw.dtype
    x = x_nchw.reshape(N, C, HW)          # NCHW kept: HW lands on lanes, no transpose

    # ---- cSE gate, hoisted (tiny (N,C)->(N,Cmid)->(N,C) chain, computed in f32) ----
    # TODO(synk): in a real network, emit this per-batch channel mean as a by-product of
    # the producing layer to avoid a third full HBM pass over x.
    mean = jnp.mean(x, axis=2, dtype=jnp.float32)                                  # (N, C)
    h = jnp.maximum(mean @ w1.astype(jnp.float32).T + b1.astype(jnp.float32), 0.0)  # (N, Cmid)
    cgate = jax.nn.sigmoid(h @ w2.astype(jnp.float32).T + b2.astype(jnp.float32))   # (N, C)
    cgate = cgate.reshape(N, C, 1).astype(jnp.float32)

    # ---- sSE weights: native (out, in) layout, bf16 for the MXU ----
    ws_bf = ws.astype(jnp.bfloat16)                                                # (C, C)
    bs2 = bs.reshape(C, 1).astype(jnp.float32)

    itemsize = jnp.dtype(io_dtype).itemsize
    THW = _pick_spatial_tile(HW, C, itemsize, N)
    HW_pad = pl.cdiv(HW, THW) * THW
    if HW_pad != HW:
        # Pad the spatial axis so tiles divide evenly (padded columns are sliced off below).
        x = jnp.pad(x, ((0, 0), (0, 0), (0, HW_pad - HW)))
    grid = (N, HW_pad // THW)

    out = pl.pallas_call(
        _scse_spatial_kernel,
        out_shape=jax.ShapeDtypeStruct((N, C, HW_pad), io_dtype),
        grid_spec=pltpu.PrefetchScalarGridSpec(
            num_scalar_prefetch=0,
            grid=grid,
            in_specs=[
                pl.BlockSpec((1, C, THW), lambda n, t: (n, 0, t)),   # x tile (lane-dense)
                pl.BlockSpec((C, C), lambda n, t: (0, 0)),           # ws (resident)
                pl.BlockSpec((C, 1), lambda n, t: (0, 0)),           # bias (resident)
                pl.BlockSpec((1, C, 1), lambda n, t: (n, 0, 0)),     # channel gate
            ],
            out_specs=pl.BlockSpec((1, C, THW), lambda n, t: (n, 0, t)),
        ),
        compiler_params=pltpu.CompilerParams(
            dimension_semantics=("parallel", "parallel"),
            vmem_limit_bytes=32 * 1024 * 1024,
        ),
    )(x, ws_bf, bs2, cgate)

    if HW_pad != HW:
        out = out[:, :, :HW]
    return out.reshape(N, C, H, W)


def scse_reference(x, w1, b1, w2, b2, ws, bs):
    # pure-JAX reference of the PyTorch forward (NCHW, f32)
    mean = jnp.mean(x, axis=(2, 3), keepdims=True)                       # (N,C,1,1)
    h = jnp.einsum('ncij,mc->nmij', mean, w1) + b1.reshape(1, -1, 1, 1)
    h = jnp.maximum(h, 0.0)
    cg = jnp.einsum('nmij,cm->ncij', h, w2) + b2.reshape(1, -1, 1, 1)
    cgate = jax.nn.sigmoid(cg)                                           # (N,C,1,1)
    sg = jnp.einsum('nchw,oc->nohw', x, ws) + bs.reshape(1, -1, 1, 1)
    sgate = jax.nn.sigmoid(sg)                                           # (N,C,H,W)
    return x * cgate + x * sgate


if __name__ == "__main__":
    N, C, H, W = 2, 32, 16, 16
    re = 16
    Cmid = C // re  # 2

    key = jax.random.PRNGKey(0)
    kx, k1, kb1, k2, kb2, ks, kbs = jax.random.split(key, 7)

    x = jax.random.normal(kx, (N, C, H, W), dtype=jnp.float32)
    # PyTorch Conv2d 1x1 weight layout (out, in) with the 1x1 spatial dims squeezed.
    w1 = 0.1 * jax.random.normal(k1, (Cmid, C), dtype=jnp.float32)
    b1 = 0.1 * jax.random.normal(kb1, (Cmid,), dtype=jnp.float32)
    w2 = 0.1 * jax.random.normal(k2, (C, Cmid), dtype=jnp.float32)
    b2 = 0.1 * jax.random.normal(kb2, (C,), dtype=jnp.float32)
    ws = 0.1 * jax.random.normal(ks, (C, C), dtype=jnp.float32)
    bs = 0.1 * jax.random.normal(kbs, (C,), dtype=jnp.float32)

    out = scse_pallas(x, w1, b1, w2, b2, ws, bs)
    out = jax.block_until_ready(out)

    ref = scse_reference(x, w1, b1, w2, b2, ws, bs)
    assert out.shape == (N, C, H, W)
    # sSE matmul runs in bf16 (f32 accumulation) -> relaxed tolerance vs the f32 reference.
    assert jnp.allclose(out, ref, atol=2e-2, rtol=2e-2), "mismatch vs reference"

    print("KERNEL_OK")
</pallas_src>

<mosaic_0001>
module attributes {stable_mosaic.version = 11 : i64} {
  func.func @_scse_spatial_kernel(%arg0: i32, %arg1: i32, %arg2: memref<1x32x256xf32, #tpu.memory_space<vmem>>, %arg3: memref<32x32xbf16, #tpu.memory_space<vmem>>, %arg4: memref<32x1xf32, #tpu.memory_space<vmem>>, %arg5: memref<1x32x1xf32, #tpu.memory_space<vmem>>, %arg6: memref<1x32x256xf32, #tpu.memory_space<vmem>>) attributes {dimension_semantics = [#tpu.dimension_semantics<parallel>, #tpu.dimension_semantics<parallel>], iteration_bounds = array<i64: 2, 1>, scalar_prefetch = 0 : i64, scratch_operands = 0 : i64, tpu.core_type = #tpu.core_type<tc>, window_params = [{transform_indices = @transform_0, window_bounds = array<i64: 1, 32, 256>}, {pipeline_mode = #tpu.pipeline_mode<synchronous>, transform_indices = @transform_1, window_bounds = array<i64: 32, 32>}, {pipeline_mode = #tpu.pipeline_mode<synchronous>, transform_indices = @transform_2, window_bounds = array<i64: 32, 1>}, {transform_indices = @transform_3, window_bounds = array<i64: 1, 32, 1>}, {transform_indices = @transform_4, window_bounds = array<i64: 1, 32, 256>}]} {
    %c0 = arith.constant 0 : index
    %c0_0 = arith.constant 0 : index
    %c0_1 = arith.constant 0 : index
    %0 = vector.load %arg2[%c0, %c0_0, %c0_1] : memref<1x32x256xf32, #tpu.memory_space<vmem>>, vector<1x32x256xf32>
    %1 = vector.shape_cast %0 : vector<1x32x256xf32> to vector<32x256xf32>
    %c0_2 = arith.constant 0 : index
    %c0_3 = arith.constant 0 : index
    %2 = vector.load %arg3[%c0_2, %c0_3] : memref<32x32xbf16, #tpu.memory_space<vmem>>, vector<32x32xbf16>
    %3 = arith.truncf %1 : vector<32x256xf32> to vector<32x256xbf16>
    %cst = arith.constant dense<0.000000e+00> : vector<32x256xf32>
    %4 = tpu.matmul %2, %3, %cst {dimension_numbers = #tpu.dot_dimension_numbers<[1], [0], [0], [1], [0, 0, 1, 1], [], []>} : vector<32x32xbf16>, vector<32x256xbf16>, vector<32x256xf32> -> vector<32x256xf32>
    %c0_4 = arith.constant 0 : index
    %c0_5 = arith.constant 0 : index
    %5 = vector.load %arg4[%c0_4, %c0_5] : memref<32x1xf32, #tpu.memory_space<vmem>>, vector<32x1xf32>
    %6 = vector.broadcast %5 : vector<32x1xf32> to vector<32x256xf32>
    %7 = arith.addf %4, %6 : vector<32x256xf32>
    %cst_6 = arith.constant 5.000000e-01 : f32
    %8 = vector.broadcast %cst_6 : f32 to vector<32x256xf32>
    %9 = arith.mulf %8, %7 : vector<32x256xf32>
    %10 = math.tanh %9 : vector<32x256xf32>
    %cst_7 = arith.constant 1.000000e+00 : f32
    %11 = vector.broadcast %cst_7 : f32 to vector<32x256xf32>
    %12 = arith.addf %11, %10 : vector<32x256xf32>
    %cst_8 = arith.constant 5.000000e-01 : f32
    %13 = vector.broadcast %cst_8 : f32 to vector<32x256xf32>
    %14 = arith.mulf %13, %12 : vector<32x256xf32>
    %c0_9 = arith.constant 0 : index
    %c0_10 = arith.constant 0 : index
    %c0_11 = arith.constant 0 : index
    %15 = vector.load %arg5[%c0_9, %c0_10, %c0_11] : memref<1x32x1xf32, #tpu.memory_space<vmem>>, vector<1x32x1xf32>
    %16 = vector.shape_cast %15 : vector<1x32x1xf32> to vector<32x1xf32>
    %17 = vector.broadcast %16 : vector<32x1xf32> to vector<32x256xf32>
    %18 = arith.addf %17, %14 : vector<32x256xf32>
    %19 = arith.mulf %1, %18 : vector<32x256xf32>
    %c0_12 = arith.constant 0 : index
    %c0_13 = arith.constant 0 : index
    %c0_14 = arith.constant 0 : index
    %20 = vector.load %arg6[%c0_12, %c0_13, %c0_14] : memref<1x32x256xf32, #tpu.memory_space<vmem>>, vector<1x32x256xf32>
    %21 = vector.shape_cast %20 : vector<1x32x256xf32> to vector<32x256xf32>
    %22 = vector.shape_cast %19 : vector<32x256xf32> to vector<1x32x256xf32>
    tpu.vector_store %arg6[%c0_12, %c0_13, %c0_14], %22 {strides = array<i32>} : memref<1x32x256xf32, #tpu.memory_space<vmem>>, vector<1x32x256xf32>,
    return
  }
  func.func @transform_0(%arg0: i32, %arg1: i32) -> (i32, i32, i32) {
    %c0_i32 = arith.constant 0 : i32
    %c0_i32_0 = arith.constant 0 : i32
    return %arg0, %c0_i32, %arg1 : i32, i32, i32
  }
  func.func @transform_1(%arg0: i32, %arg1: i32) -> (i32, i32) {
    %c0_i32 = arith.constant 0 : i32
    %c0_i32_0 = arith.constant 0 : i32
    %c0_i32_1 = arith.constant 0 : i32
    return %c0_i32, %c0_i32_0 : i32, i32
  }
  func.func @transform_2(%arg0: i32, %arg1: i32) -> (i32, i32) {
    %c0_i32 = arith.constant 0 : i32
    %c0_i32_0 = arith.constant 0 : i32
    %c0_i32_1 = arith.constant 0 : i32
    return %c0_i32, %c0_i32_0 : i32, i32
  }
  func.func @transform_3(%arg0: i32, %arg1: i32) -> (i32, i32, i32) {
    %c0_i32 = arith.constant 0 : i32
    %c0_i32_0 = arith.constant 0 : i32
    %c0_i32_1 = arith.constant 0 : i32
    return %arg0, %c0_i32, %c0_i32_0 : i32, i32, i32
  }
  func.func @transform_4(%arg0: i32, %arg1: i32) -> (i32, i32, i32) {
    %c0_i32 = arith.constant 0 : i32
    %c0_i32_0 = arith.constant 0 : i32
    return %arg0, %c0_i32, %arg1 : i32, i32, i32
  }
}

</mosaic_0001>

<bundles_post_ra>
// kernel: tpu_custom_call.1
= control target key start
LH: loop header
LB: loop body
LE: loop exit
PB: predicated region body
PF: predicated region fallthrough
CT: control target
= control target key end

     0   :  { %9 = vsyncpa [#allocation3], 0  ;;  %s1057_s0 = inlined_call_operand.hbm [shape: f32[2,32,256], index: 0, kind: input, shape index: {}]   ;;  %s1058_s1 = inlined_call_operand.vmem [shape: bf16[32,32], index: 1, kind: input, shape index: {}]   ;;  %s1059_s2 = inlined_call_operand.vmem [shape: f32[32,1], index: 2, kind: input, shape index: {}]   ;;  %s1060_s3 = inlined_call_operand.vmem [shape: f32[2,32,1], index: 3, kind: input, shape index: {}]   ;;  %s1061_s4 = inlined_call_operand.hbm [shape: f32[2,32,256], index: 4, kind: output, shape index: {}]  }
   0x1   :  { %11 = vsyncpa [#allocation3 + $0x1], 0 }
   0x2   :  { %12 = vsyncpa [#allocation4], 0 }
   0x3   :  { %14 = vsyncpa [#allocation4 + $0x1], 0  ;;  %s823_s15 = smov 0   ;;  %s825_s16 = smov 0  }
   0x4   :  { %s827_s17 = smov 0   ;;  %s829_s18 = smov 0  }
   0x5   :  { %s831_s19 = smov 0   ;;  %s833_s20 = smov 0  }
   0x6 LB: > { %s562_s21 = sadd.s32 4294967295, %s789_s20   ;;  %s563_s22 = sadd.s32 4294967294, %s789_s20   ;;  %s789_s20 = sphi %s833_s20, %s20_s20   ;;  %s785_s19 = sphi %s831_s19, %s1076_s19   ;;  %s781_s18 = sphi %s829_s18, %s1075_s18   ;;  %s777_s17 = sphi %s827_s17, %s1074_s17   ;;  %s773_s16 = sphi %s825_s16, %s1073_s16   ;;  %s769_s15 = sphi %s823_s15, %s1072_s15  }
   0x7   : > { %s32_s23 = sadd.s32 1, %s785_s19  ;;  %s41_s24 = sadd.s32 1, %s777_s17 }
   0x8   : > { %p34_p0 = scmp.ge.s32.totalorder %s32_s23, 2  ;;  %p48_p1 = scmp.ne.s32.totalorder %s777_s17, %s773_s16 }
   0x9   : > { %p49_p2 = scmp.eq.s32.totalorder %s789_s20, 0  ;;  %p54_p3 = scmp.ne.s32.totalorder %s773_s16, %s769_s15 }
   0xa   : > { %s1078_s23 = smov (%p34_p0, %s32_s23), 0  ;;  %p55_p5 = scmp.eq.s32.totalorder %s562_s21, 0 }
   0xb   : > { %p864_p4 = por %p49_p2, %p48_p1  ;;  %s36_s26 = ssub.s32 %s785_s19, %s1078_s23 }
   0xc   : > { %p148_p6 = scmp.eq.s32.totalorder %s562_s21, 1  ;;  %p39_p7 = scmp.eq.s32.totalorder %s36_s26, 0 }
   0xd   : > { %p870_p8 = por %p55_p5, %p54_p3  ;;  %p154_p10 = scmp.eq.s32.totalorder %s563_s22, 1 }
   0xe   : > { %p874_p9 = por %p148_p6, %p48_p1  ;;  %p602_p13 = scmp.lt.s32.totalorder %s789_s20, 2 }
   0xf   : > { %s879_s29 = scalar_select %p39_p7, %s777_s17, %s41_s24  }
  0x10   : > { %s1065_s28 = scalar_select %p874_p9, 1, 0 }
  0x11   : > { %p881_p11 = por %p154_p10, %p54_p3  ;;  %s180_s5 = sand.u32 1, %s777_s17  }
  0x12   : > { %s566_s6 = sshll.u32 %s180_s5, 6  ;;  %s583_s7 = sshll.u32 %s785_s19, 10 }
  0x13   : > { %s1066_s30 = scalar_select %p881_p11, 1, 0 }
  0x14   : > { %s892_s10 = scalar_lea.hbm %s1057_s0, %s583_s7  ;;  %s184_s11 = scalar_lea.vmem [#allocation2], %s566_s6 }
  0x15   : > { %s193_s12 = sshll.u32 %s184_s11, 4  ;;  %p898_p0 = pnand %p602_p13, %p864_p4  ;;  %s894_s12 = int_to_ptr.vmem [resolvable:$true] %s193_s12 }
  0x16   : > { %s903_s14 = scalar_lea.sflag [#allocation3], %s180_s5  ;;  %s677_s21 = scalar_lea.hbm %s892_s10, 1024 }
  0x17   : > { %p678_p2 = scmp.ne.s32.totalorder %s892_s10, %s677_s21  ;;  %p679_p3 = pneg %p898_p0 }
  0x18   : > { %s682_s25 = scalar_lea.hbm %s1057_s0, 2048  ;;  %p683_p4 = scmp.lt.u32.totalorder %s892_s10, %s1057_s0 }
  0x19   : > { %p680_p5 = pnand %p679_p3, %p678_p2  ;;  %p684_p7 = scmp.lt.u32.totalorder %s682_s25, %s677_s21 }
  0x1a   : > { %p686_p13 = scmp.lt.u32.totalorder %s677_s21, %s892_s10 }
  0x1b   : > { %p681_p6 = pneg %p680_p5  ;;  %p685_p10 = por %p684_p7, %p683_p4 }
  0x1d   : > { %p687_p12 = por %p686_p13, %p685_p10 }
  0x1f   : > { %p688_p1 = pnand %p687_p12, %p681_p6 }
  0x21   : > { %691 = shalt.err (!%p688_p1)
}
  0x22   : > { %s692_s5 = scalar_lea.vmem %s894_s12, 1024  ;;  %s791_s7 = smov [#allocation2]  }
  0x23   : > { %p693_p2 = scmp.ne.s32.totalorder %s894_s12, %s692_s5  ;;  %s697_s8 = sshll.u32 %s791_s7, 4  ;;  %s698_s8 = int_to_ptr.vmem [resolvable:$false] %s697_s8 }
  0x24   : > { %s699_s9 = scalar_lea.vmem %s698_s8, 2048  ;;  %p700_p9 = scmp.lt.s32.totalorder %s894_s12, %s698_s8 }
  0x25   : > { %p695_p5 = pnand %p693_p2, %p679_p3  ;;  %p701_p4 = scmp.lt.s32.totalorder %s699_s9, %s692_s5 }
  0x27   : > { %p696_p11 = pneg %p695_p5  ;;  %p702_p7 = por %p701_p4, %p700_p9 }
  0x29   : > { %p703_p10 = pnand %p702_p7, %p696_p11 }
  0x2b   : > { %706 = shalt.err (!%p703_p10)
}
  0x2c   : > { %s792_s11 = smov 256   ;;  %s793_s21 = smov 16  }
  0x2d   : > { %597 = dma.hbm_to_vmem [thread:$0]  (!%p898_p0), %s892_s10, 1024, %s894_s12, %s903_s14, %s792_s11, %s792_s11, %s793_s21  }
  0x2e   : > { %p209_p12 = scmp.lt.s32.totalorder %s789_s20, 3  ;;  %p1068_p1 = scmp.ge.s32.totalorder %s789_s20, 1 }
  0x30   : > { %p210_p3 = pnand %p1068_p1, %p209_p12 }
  0x31   : > { %s935_s22 = sand.u32 (!%p210_p3), 1, %s773_s16  }
  0x32   : > { %213 = sbr.rel (%p210_p3) target bundleno = 326 (0x146), region = 36  ;;  %s570_s24 = sshll.u32 (!%p210_p3), %s935_s22, 6 }
  0x33   : > { %s216_s25 = scalar_lea.sflag (!%p210_p3), [#allocation3], %s935_s22  ;;  %s219_s26 = scalar_lea.vmem (!%p210_p3), [#allocation2], %s570_s24 }
  0x39   : > { %760 = dma.done.wait (%p870_p8), %s216_s25, 1024  }
  0x3a   : > { %762 = vsyncadd (%p870_p8), %s216_s25, 4294966272  ;;  %v794_v0 = vmov 0   ;;  %p250_p9 = scmp.lt.s32.totalorder %s781_s18, 1  ;;  %v946_v1 = vld [vmem:[%s219_s26 + $0x8] sm:$0xff]  ;;  %v948_v2 = vld [vmem:[%s219_s26 + $0x18] sm:$0xff]  ;;  %vm307_vm0 = vcmask 261120  }
  0x3b   : > { %346 = vmatprep.mubr.bf16.mxu0 %v794_v0  ;;  %356 = vmatprep.mubr.bf16.mxu1 %v794_v0  ;;  %v950_v3 = vld [vmem:[%s219_s26] sm:$0xff]  ;;  %v270_v4 = vpack.c.bf16 %v948_v2, %v946_v1  ;;  %v954_v5 = vld [vmem:[%s219_s26 + $0x10] sm:$0xff]  ;;  %v956_v6 = vld [vmem:[%s219_s26 + $0x28] sm:$0xff]  ;;  %s248_s13 = scalar_lea.vmem [#allocation5], %s570_s24  ;;  %s585_s14 = sshll.u32 %s781_s18, 10 }
  0x3c   : > { %658 = vset.pattern.permute.xlu1 %v794_v0  ;;  %657 = vset.pattern.permute.xlu0 %v794_v0  ;;  %v958_v7 = vld [vmem:[%s219_s26 + $0x38] sm:$0xff]  ;;  %s251_s27 = scalar_select %p250_p9, %s781_s18, 1  ;;  %v269_v8 = vpack.c.bf16 %v954_v5, %v950_v3  ;;  %v965_v10 = vld [vmem:[%s219_s26 + $0x20] sm:$0xff]  ;;  %v967_v11 = vld [vmem:[%s219_s26 + $0x30] sm:$0xff] }
  0x3d   : > { %v272_v9 = vpack.c.bf16 %v958_v7, %v956_v6  ;;  %314 = vmatprep.subr.bf16.mxu0 %v270_v4  ;;  %586 = vmatprep.subr.bf16.mxu1 %v270_v4  ;;  %v271_v12 = vpack.c.bf16 %v967_v11, %v965_v10  ;;  %v275_v13 = vld [vmem:[%s1059_s2 + $0x10] sm:$0xff]  ;;  %v273_v14 = vld [vmem:[%s1059_s2] sm:$0xff]  ;;  %v660_v16 = vld [vmem:[%s1058_s1 + $0x8] sm:$0xff]   ;;  %s1005_s7 = scalar_lea.hbm %s1061_s4, %s585_s14  ;;  %s448_s18 = scalar_lea.sflag [#allocation4], %s935_s22 }
  0x3e   : > { %315 = vmatpush1.bf16.msra.mxu0 %v269_v8  ;;  %588 = vmatpush1.bf16.msra.mxu1 %v269_v8  ;;  %s584_s6 = sshll.u32 %s251_s27, 5  ;;  %v659_v15 = vld [vmem:[%s1058_s1] sm:$0xff]   ;;  %v276_v17 = vld [vmem:[%s1059_s2 + $0x18] sm:$0xff]  ;;  %v274_v18 = vld [vmem:[%s1059_s2 + $0x8] sm:$0xff]  ;;  %p1069_p11 = scmp.ne.s32.totalorder %s1065_s28, 0 }
  0x3f   : > { %316 = vmatprep.subr.bf16.mxu0 %v272_v9  ;;  %587 = vmatprep.subr.bf16.mxu1 %v272_v9  ;;  %s254_s12 = scalar_lea.vmem %s1060_s3, %s584_s6  ;;  %s463_s6 = sshll.u32 %s248_s13, 4  ;;  %s1007_s6 = int_to_ptr.vmem [resolvable:$true] %s463_s6 }
  0x40   : > { %289 = vperm.xlu1 %658, %v275_v13   ;;  %279 = vperm.xlu0 %657, %v273_v14   ;;  %v400_v19 = vld [vmem:[%s254_s12 + $0x8] sm:$0xff]  ;;  %v399_v20 = vld [vmem:[%s254_s12] sm:$0xff]  ;;  %v402_v21 = vld [vmem:[%s254_s12 + $0x18] sm:$0xff]  ;;  %s707_s8 = scalar_lea.vmem %s1007_s6, 1024  ;;  %s795_s9 = smov [#allocation5]  }
  0x41   : > { %v401_v22 = vld [vmem:[%s254_s12 + $0x10] sm:$0xff]  ;;  %p708_p8 = scmp.ne.s32.totalorder %s1007_s6, %s707_s8  ;;  %s711_s11 = sshll.u32 %s795_s9, 4  ;;  %s712_s11 = int_to_ptr.vmem [resolvable:$false] %s711_s11 }
  0x42   : > { %317 = vmatpush1.bf16.msra.mxu0 %v271_v12  ;;  %589 = vmatpush1.bf16.msra.mxu1 %v271_v12  ;;  %s713_s21 = scalar_lea.vmem %s712_s11, 2048  ;;  %p714_p13 = scmp.lt.s32.totalorder %s1007_s6, %s712_s11 }
  0x43   : > { %p709_p0 = pnand %p708_p8, %p1069_p11  ;;  %p715_p2 = scmp.lt.s32.totalorder %s713_s21, %s707_s8 }
  0x44   : > { %294 = vperm.xlu1 %658, %v276_v17   ;;  %284 = vperm.xlu0 %657, %v274_v18  }
  0x45   : > { %576 = vmatmul.mubr.msk.bf16.vlgmr.msra.gmra.mrb[0].mxu0 %vm307_vm0, %v659_v15  ;;  %577 = vmatmul.mubr.msk.bf16.vlgmr.msra.gmra.mrb[0].mxu1 %vm307_vm0, %v660_v16  ;;  %p710_p6 = pneg %p709_p0  ;;  %p716_p5 = por %p715_p2, %p714_p13 }
  0x47   : > { %p717_p4 = pnand %p716_p5, %p710_p6 }
  0x48   : > { %410 = vperm.xlu1 %658, %v400_v19   ;;  %405 = vperm.xlu0 %657, %v399_v20  }
  0x4c   : > { %420 = vperm.xlu1 %658, %v402_v21   ;;  %415 = vperm.xlu0 %657, %v401_v22  }
  0xbf   : > { %v290_v23 = vpop.permute.xlu1 %289  ;;  %v280_v24 = vpop.permute.xlu0 %279 }
  0xc3   : > { %v295_v25 = vpop.permute.xlu1 %294  ;;  %v285_v26 = vpop.permute.xlu0 %284 }
  0xc7   : > { %v406_v51 = vpop.permute.xlu0 %405  ;;  %v411_v58 = vpop.permute.xlu1 %410 }
  0xcb   : > { %v416_v4 = vpop.permute.xlu0 %415 }
 0x118   : > { %v348_v27 = vpop.f32.mrb[0].mxu0  ;;  %v358_v28 = vpop.f32.mrb[0].mxu1 }
 0x119   : > { %v349_v29 = vadd.f32 %v348_v27, %v280_v24  ;;  %v359_v30 = vadd.f32 %v358_v28, %v290_v23  ;;  %v350_v31 = vpop.f32.mrb[1].mxu0  ;;  %v360_v32 = vpop.f32.mrb[1].mxu1 }
 0x11a   : > { %v351_v33 = vadd.f32 %v350_v31, %v280_v24  ;;  %v361_v34 = vadd.f32 %v360_v32, %v290_v23  ;;  %v352_v35 = vpop.f32.mrb[2].mxu0  ;;  %v362_v36 = vpop.f32.mrb[2].mxu1 }
 0x11b   : > { %v367_v37 = vmul.f32 0.5, %v349_v29  ;;  %v371_v38 = vmul.f32 0.5, %v359_v30  ;;  %v353_v39 = vadd.f32 %v352_v35, %v285_v26  ;;  %v363_v40 = vadd.f32 %v362_v36, %v295_v25  ;;  %v354_v41 = vpop.f32.mrb[3].mxu0  ;;  %v364_v42 = vpop.f32.mrb[3].mxu1 }
 0x11c   : > { %v368_v43 = vmul.f32 0.5, %v351_v33  ;;  %v372_v44 = vmul.f32 0.5, %v361_v34  ;;  %v355_v45 = vadd.f32 %v354_v41, %v285_v26  ;;  %v365_v46 = vadd.f32 %v364_v42, %v295_v25  ;;  %v421_v26 = vpop.permute.xlu1 %420 }
 0x11d   : > { %661 = vtanh.f32 %v367_v37  ;;  %v369_v47 = vmul.f32 0.5, %v353_v39  ;;  %v373_v48 = vmul.f32 0.5, %v363_v40 }
 0x11e   : > { %663 = vtanh.f32 %v371_v38  ;;  %v370_v49 = vmul.f32 0.5, %v355_v45  ;;  %v374_v50 = vmul.f32 0.5, %v365_v46 }
 0x11f   : > { %665 = vtanh.f32 %v368_v43 }
 0x120   : > { %667 = vtanh.f32 %v372_v44 }
 0x121   : > { %669 = vtanh.f32 %v369_v47 }
 0x122   : > { %671 = vtanh.f32 %v373_v48 }
 0x123   : > { %673 = vtanh.f32 %v370_v49 }
 0x124   : > { %675 = vtanh.f32 %v374_v50 }
 0x127   : > { %v662_v52 = vpop.eup %661 }
 0x128   : > { %v664_v53 = vpop.eup %663  ;;  %v383_v54 = vadd.f32 1.0, %v662_v52 }
 0x129   : > { %v666_v55 = vpop.eup %665  ;;  %v387_v56 = vadd.f32 1.0, %v664_v53 }
 0x12a   : > { %v668_v57 = vpop.eup %667  ;;  %v391_v59 = vmul.f32 0.5, %v383_v54  ;;  %v384_v60 = vadd.f32 1.0, %v666_v55 }
 0x12b   : > { %v670_v61 = vpop.eup %669  ;;  %v395_v62 = vmul.f32 0.5, %v387_v56  ;;  %v388_v63 = vadd.f32 1.0, %v668_v57 }
 0x12c   : > { %v672_v0 = vpop.eup %671  ;;  %v423_v8 = vadd.f32 %v406_v51, %v391_v59  ;;  %v392_v9 = vmul.f32 0.5, %v384_v60  ;;  %v385_v12 = vadd.f32 1.0, %v670_v61 }
 0x12d   : > { %v674_v13 = vpop.eup %673  ;;  %v427_v14 = vadd.f32 %v416_v4, %v395_v62  ;;  %v396_v15 = vmul.f32 0.5, %v388_v63  ;;  %v389_v16 = vadd.f32 1.0, %v672_v0 }
 0x12e   : > { %v676_v17 = vpop.eup %675  ;;  %v431_v18 = vmul.f32 %v423_v8, %v950_v3  ;;  %v424_v19 = vadd.f32 %v406_v51, %v392_v9  ;;  %v393_v20 = vmul.f32 0.5, %v385_v12  ;;  %v386_v21 = vadd.f32 1.0, %v674_v13 }
 0x12f   : > { %v435_v22 = vmul.f32 %v427_v14, %v965_v10  ;;  %v428_v23 = vadd.f32 %v416_v4, %v396_v15  ;;  %v397_v24 = vmul.f32 0.5, %v389_v16  ;;  %v390_v25 = vadd.f32 1.0, %v676_v17 }
 0x130   : > { %439 = vst [vmem:[%s248_s13] sm:$0xff] %v431_v18  ;;  %v432_v27 = vmul.f32 %v424_v19, %v946_v1  ;;  %v425_v28 = vadd.f32 %v411_v58, %v393_v20  ;;  %v394_v29 = vmul.f32 0.5, %v386_v21 }
 0x131   : > { %443 = vst [vmem:[%s248_s13 + $0x20] sm:$0xff] %v435_v22  ;;  %v436_v3 = vmul.f32 %v428_v23, %v956_v6  ;;  %v429_v30 = vadd.f32 %v421_v26, %v397_v24  ;;  %v398_v31 = vmul.f32 0.5, %v390_v25 }
 0x132   : > { %440 = vst [vmem:[%s248_s13 + $0x8] sm:$0xff] %v432_v27  ;;  %v433_v10 = vmul.f32 %v425_v28, %v954_v5  ;;  %v426_v32 = vadd.f32 %v411_v58, %v394_v29 }
 0x133   : > { %444 = vst [vmem:[%s248_s13 + $0x28] sm:$0xff] %v436_v3  ;;  %v437_v33 = vmul.f32 %v429_v30, %v967_v11  ;;  %v430_v34 = vadd.f32 %v421_v26, %v398_v31 }
 0x134   : > { %441 = vst [vmem:[%s248_s13 + $0x10] sm:$0xff] %v433_v10  ;;  %v434_v1 = vmul.f32 %v426_v32, %v948_v2 }
 0x135   : > { %445 = vst [vmem:[%s248_s13 + $0x30] sm:$0xff] %v437_v33  ;;  %v438_v5 = vmul.f32 %v430_v34, %v958_v7 }
 0x136   : > { %442 = vst [vmem:[%s248_s13 + $0x18] sm:$0xff] %v434_v1 }
 0x137   : > { %446 = vst [vmem:[%s248_s13 + $0x38] sm:$0xff] %v438_v5 }
 0x138   : > { %720 = shalt.err (!%p717_p4)
}
 0x139   : > { %s721_s25 = scalar_lea.hbm %s1005_s7, 1024  ;;  %s725_s10 = scalar_lea.hbm %s1061_s4, 2048 }
 0x13a   : > { %p722_p7 = scmp.ne.s32.totalorder %s1005_s7, %s721_s25  ;;  %p726_p1 = scmp.lt.u32.totalorder %s1005_s7, %s1061_s4 }
 0x13b   : > { %p727_p3 = scmp.lt.u32.totalorder %s725_s10, %s721_s25  ;;  %p729_p8 = scmp.lt.u32.totalorder %s721_s25, %s1005_s7 }
 0x13c   : > { %p723_p10 = pnand %p722_p7, %p1069_p11 }
 0x13d   : > { %p728_p9 = por %p727_p3, %p726_p1 }
 0x13e   : > { %p724_p12 = pneg %p723_p10 }
 0x13f   : > { %p730_p0 = por %p729_p8, %p728_p9 }
 0x141   : > { %p731_p6 = pnand %p730_p0, %p724_p12 }
 0x143   : > { %734 = shalt.err (!%p731_p6)
}
 0x144   : > { %s796_s14 = smov 256   ;;  %s797_s24 = smov 16  }
 0x145   : > { %592 = dma.vmem_to_hbm [thread:$0]  (%p1069_p11), %s1007_s6, 1024, %s1005_s7, %s448_s18, %s796_s14, %s796_s14, %s797_s24  }
 0x146 PF: > { %s478_s5 = sand.u32 1, %s769_s15   ;;  %p1070_p13 = scmp.ne.s32.totalorder %s1066_s30, 0 }
 0x147   : > { %p1071_p2 = scmp.ge.s32.totalorder %s789_s20, 2  ;;  %s479_s8 = scalar_lea.sflag [#allocation4], %s478_s5 }
 0x149   : > { %p599_p5 = pnand %p1071_p2, %p1070_p13 }
 0x14b   : > { %764 = dma.done.wait (!%p599_p5), %s479_s8, 1024  }
 0x14c   : > { %766 = vsyncadd (!%p599_p5), %s479_s8, 4294966272  ;;  %s20_s20 = sadd.s32 1, %s789_s20   ;;  %s1072_s15 = smov %s773_s16 }
 0x14d   : > { %p17_p4 = scmp.ge.s32.totalorder %s20_s20, 4   ;;  %s1073_s16 = smov %s777_s17 }
 0x14e   : > { %s1074_s17 = smov %s879_s29  ;;  %s1075_s18 = smov %s785_s19 }
 0x14f   : > { %s1076_s19 = smov %s1078_s23  ;;  %19 = sbr.rel (!%p17_p4) target bundleno = 6 (0x6), region = 84 }
 0x156   :  { %484 = vsyncpa [#allocation3], 1 }
 0x157   :  { %486 = vsyncpa [#allocation3 + $0x1], 1 }
 0x158   :  { %487 = vsyncpa [#allocation4], 1 }
 0x159   :  { %489 = vsyncpa [#allocation4 + $0x1], 1 }

</bundles_post_ra>
